<compile_context>
chip_gen: v7x
topology: tpu7x:2x2x1
jax: 0.10.0
libtpu: 0.0.40
codegen_flags: <defaults>
</compile_context>

<pallas_src>
import jax
import jax.numpy as jnp
from jax import lax
from jax.experimental import pallas as pl
from jax.experimental.pallas import tpu as pltpu


def _vmem_limit_bytes():
    """Generation-aware scoped-VMEM budget: ~3/4 of physical, capped at 64 MiB.
    -> 64 MiB on v5e/v6e (128 MiB physical), 48 MiB on v7x (64 MiB physical)."""
    try:
        cap = pltpu.get_tpu_info().vmem_capacity_bytes
    except Exception:  # interpret mode / older builds
        cap = 128 * 1024 * 1024
    return int(min(cap * 3 // 4, 64 * 1024 * 1024))


def _pick_tile(n, preferred, align=8):
    """Largest tile <= preferred that evenly divides n and is a multiple of
    `align`; falls back to the full dimension (full blocks are always legal).
    # TODO(synk): for very large, oddly-sized n this falls back to one huge
    # block; pad n in the wrapper if that would exceed the VMEM budget."""
    if n <= preferred:
        return n
    t = (preferred // align) * align
    while t >= align:
        if n % t == 0:
            return t
        t -= align
    return n


# --------------------------------------------------------------- 1) QKV projection
def _qkv_kernel(x_ref, wq_ref, wk_ref, wv_ref, q_ref, k_ref, v_ref):
    # x_ref: (1, tt, C) f32 ; w*_ref: (1, C, D) bf16 (scales pre-folded)
    x = x_ref[0].astype(jnp.bfloat16)                     # (tt, C)
    q_ref[0] = jnp.dot(x, wq_ref[0],
                       preferred_element_type=jnp.float32).astype(q_ref.dtype)
    k_ref[0] = jnp.dot(x, wk_ref[0],
                       preferred_element_type=jnp.float32).astype(k_ref.dtype)
    v_ref[0] = jnp.dot(x, wv_ref[0],
                       preferred_element_type=jnp.float32).astype(v_ref.dtype)


def _qkv_projection(x, wq_h, wk_h, wv_h, vmem_limit):
    """x: (B, T, C); w*_h: (H, C, D) bf16.  Returns q, k, v as (B*H, T, D) bf16,
    i.e. already head-split — no wrapper transpose needed."""
    B, T, C = x.shape
    H, _, D = wq_h.shape
    tt = _pick_tile(T, 512)
    x_spec = pl.BlockSpec((1, tt, C), lambda b, i, h: (b, i, 0))
    w_spec = pl.BlockSpec((1, C, D), lambda b, i, h: (h, 0, 0))
    out_spec = pl.BlockSpec((1, tt, D), lambda b, i, h: (b * H + h, i, 0))
    out_shape = jax.ShapeDtypeStruct((B * H, T, D), jnp.bfloat16)
    return pl.pallas_call(
        _qkv_kernel,
        out_shape=(out_shape, out_shape, out_shape),
        grid_spec=pltpu.PrefetchScalarGridSpec(
            num_scalar_prefetch=0,
            # h innermost: the x tile index is unchanged across h, so it stays
            # resident; per-head (C, D) weight blocks stream (v7x-safe).
            grid=(B, T // tt, H),
            in_specs=[x_spec, w_spec, w_spec, w_spec],
            out_specs=(out_spec, out_spec, out_spec),
        ),
        compiler_params=pltpu.CompilerParams(
            dimension_semantics=("parallel", "parallel", "parallel"),
            vmem_limit_bytes=vmem_limit),
    )(x, wq_h, wk_h, wv_h)


# --------------------------------------------------------------- 2) flash attention
def _flash_kernel(q_ref, k_ref, v_ref, o_ref, m_sc, l_sc, acc_sc):
    kv = pl.program_id(2)

    @pl.when(kv == 0)
    def _():
        m_sc[...] = jnp.full_like(m_sc, -jnp.inf)
        l_sc[...] = jnp.zeros_like(l_sc)
        acc_sc[...] = jnp.zeros_like(acc_sc)

    q = q_ref[0]                                          # (tq, D) bf16, scale folded
    k = k_ref[0]                                          # (tk, D) bf16
    v = v_ref[0]                                          # (tk, D) bf16

    # scores = q @ k^T on the MXU (bf16 operands, f32 accumulation); the full
    # score scale (C^-1 * D^-0.5) is already folded into wq, so no VPU multiply.
    s = lax.dot_general(q, k, (((1,), (1,)), ((), ())),
                        preferred_element_type=jnp.float32)            # (tq, tk)

    m_prev = m_sc[...]
    m_new = jnp.maximum(m_prev, jnp.max(s, axis=-1, keepdims=True))
    alpha = jnp.exp(m_prev - m_new)
    p = jnp.exp(s - m_new)                                 # f32 softmax math
    l_sc[...] = alpha * l_sc[...] + jnp.sum(p, axis=-1, keepdims=True)
    acc_sc[...] = alpha * acc_sc[...] + jnp.dot(
        p.astype(jnp.bfloat16), v, preferred_element_type=jnp.float32)
    m_sc[...] = m_new

    @pl.when(kv == pl.num_programs(2) - 1)
    def _():
        inv_l = pl.reciprocal(l_sc[...], approx=True)      # EUP vrcp, near-free
        o_ref[0] = (acc_sc[...] * inv_l).astype(o_ref.dtype)


def _flash_attention(q, k, v, *, tq, tk, vmem_limit):
    BH, T, D = q.shape
    return pl.pallas_call(
        _flash_kernel,
        out_shape=jax.ShapeDtypeStruct((BH, T, D), jnp.bfloat16),
        grid_spec=pltpu.PrefetchScalarGridSpec(
            num_scalar_prefetch=0,
            grid=(BH, T // tq, T // tk),                   # kv reduction axis last
            in_specs=[pl.BlockSpec((1, tq, D), lambda b, i, j: (b, i, 0)),
                      pl.BlockSpec((1, tk, D), lambda b, i, j: (b, j, 0)),
                      pl.BlockSpec((1, tk, D), lambda b, i, j: (b, j, 0))],
            out_specs=pl.BlockSpec((1, tq, D), lambda b, i, j: (b, i, 0)),
            scratch_shapes=[pltpu.VMEM((tq, 1), jnp.float32),   # running max m
                            pltpu.VMEM((tq, 1), jnp.float32),   # running sum l
                            pltpu.VMEM((tq, D), jnp.float32)],  # output accumulator
        ),
        compiler_params=pltpu.CompilerParams(
            dimension_semantics=("parallel", "parallel", "arbitrary"),
            vmem_limit_bytes=vmem_limit),
    )(q, k, v)


# --------------------------------------------------- 3) output projection (head merge)
def _proj_kernel(a_ref, wp_ref, o_ref, acc_ref):
    h = pl.program_id(2)

    @pl.when(h == 0)
    def _():
        acc_ref[...] = jnp.zeros_like(acc_ref)

    # per-head partial product accumulated over the (arbitrary) h axis:
    # out[b, t, :] = sum_h attn[b, h, t, :] @ wp_h[h]
    acc_ref[...] += jnp.dot(a_ref[0], wp_ref[0],
                            preferred_element_type=jnp.float32)

    @pl.when(h == pl.num_programs(2) - 1)
    def _():
        o_ref[0] = acc_ref[...].astype(o_ref.dtype)


def _out_projection(attn, wp_h, B, out_dtype, vmem_limit):
    """attn: (B*H, T, D) bf16 ; wp_h: (H, D, out_pad) bf16 (inner^-0.5 folded).
    Returns (B, T, out_pad), out_pad a multiple of 128 (lane-dense stores).
    The head merge happens in the reduction grid axis — no wrapper transpose."""
    BH, T, D = attn.shape
    H = BH // B
    out_pad = wp_h.shape[2]
    tm = _pick_tile(T, 512)
    return pl.pallas_call(
        _proj_kernel,
        out_shape=jax.ShapeDtypeStruct((B, T, out_pad), out_dtype),
        grid_spec=pltpu.PrefetchScalarGridSpec(
            num_scalar_prefetch=0,
            grid=(B, T // tm, H),                           # head reduction last
            in_specs=[pl.BlockSpec((1, tm, D), lambda b, i, h: (b * H + h, i, 0)),
                      pl.BlockSpec((1, D, out_pad), lambda b, i, h: (h, 0, 0))],
            out_specs=pl.BlockSpec((1, tm, out_pad), lambda b, i, h: (b, i, 0)),
            scratch_shapes=[pltpu.VMEM((tm, out_pad), jnp.float32)],
        ),
        compiler_params=pltpu.CompilerParams(
            dimension_semantics=("parallel", "parallel", "arbitrary"),
            vmem_limit_bytes=vmem_limit),
    )(attn, wp_h)


# --------------------------------------------------------------- top-level wrapper
def multi_head_attention(x, w_query, w_key, w_value, w_proj, *, num_heads, head_dim):
    """x: (B, T, C); w_query/key/value: (inner, C); w_proj: (out_dim, inner).
    Matches MultiHeadAttention.forward of the PyTorch module."""
    B, T, C = x.shape
    H, D = num_heads, head_dim
    inner = H * D
    out_dim = w_proj.shape[0]
    out_pad = ((out_dim + 127) // 128) * 128
    vmem_limit = _vmem_limit_bytes()

    # ---- weight prep (one-time layout plumbing; scales folded in f32) ----
    # reference math: q,k,v = (x @ w.T) * C^-0.5 ; scores *= D^-0.5 ; out *= inner^-0.5
    # folded:  wq *= C^-1 * D^-0.5  (absorbs both C^-0.5 factors and D^-0.5)
    #          wk *= 1 ; wv *= C^-0.5 ; wp *= inner^-0.5
    def per_head(w, scale):                      # (inner, C) -> (H, C, D) bf16
        w = w.astype(jnp.float32) * scale        # scale in f32 before bf16 cast
        return w.T.reshape(C, H, D).transpose(1, 0, 2).astype(jnp.bfloat16)

    wq_h = per_head(w_query, (1.0 / C) * D ** (-0.5))
    wk_h = per_head(w_key, 1.0)
    wv_h = per_head(w_value, C ** (-0.5))

    wp_h = (w_proj.astype(jnp.float32) * inner ** (-0.5)).T   # (inner, out_dim)
    wp_h = wp_h.reshape(H, D, out_dim)
    if out_pad != out_dim:                       # lane-dense output slab
        wp_h = jnp.pad(wp_h, ((0, 0), (0, 0), (0, out_pad - out_dim)))
    wp_h = wp_h.astype(jnp.bfloat16)

    # ---- 1) fused QKV projection: emits (B*H, T, D) directly (no split_heads) ----
    q, k, v = _qkv_projection(x, wq_h, wk_h, wv_h, vmem_limit)

    # ---- 2) flash attention (online softmax, never materializes (T, T) fully) ----
    tq = _pick_tile(T, 256)   # 256 fills the 256-wide MXU M dim on v6e/v7x
    tk = _pick_tile(T, 512)   # large kv tiles amortize the ~0.35 us per-step overhead
    oh = _flash_attention(q, k, v, tq=tq, tk=tk, vmem_limit=vmem_limit)

    # ---- 3) output projection with in-kernel head merge (no merge transpose) ----
    out = _out_projection(oh, wp_h, B, x.dtype, vmem_limit)
    if out_pad != out_dim:
        out = out[:, :, :out_dim]
    return out


# --------------------------------------------------------------- reference & test
def _reference(x, w_query, w_key, w_value, w_proj, *, num_heads, head_dim):
    """Pure-JAX f32 reference mirroring the PyTorch forward exactly."""
    B, T, C = x.shape
    inner = num_heads * head_dim

    def lin(w):  # F.linear(x, w) = x @ w.T
        y = jnp.einsum('btc,ic->bti', x, w)
        return (y.reshape(B, T, num_heads, head_dim).transpose(0, 2, 1, 3)
                * C ** (-0.5))

    q, k, v = lin(w_query), lin(w_key), lin(w_value)
    w = jnp.einsum('bhtd,bhsd->bhts', q, k) * head_dim ** (-0.5)
    w = jax.nn.softmax(w, axis=-1)
    out = jnp.einsum('bhts,bhsd->bhtd', w, v).transpose(0, 2, 1, 3).reshape(B, T, inner)
    return jnp.einsum('bti,oi->bto', out, w_proj) * inner ** (-0.5)


if __name__ == "__main__":
    B, T, C = 2, 8, 32
    num_heads, head_dim, out_dim = 4, 8, 32
    inner = num_heads * head_dim

    key = jax.random.PRNGKey(0)
    kx, kq, kk, kv, kp = jax.random.split(key, 5)
    x = jax.random.normal(kx, (B, T, C), dtype=jnp.float32)
    w_query = jax.random.normal(kq, (inner, C), dtype=jnp.float32)
    w_key = jax.random.normal(kk, (inner, C), dtype=jnp.float32)
    w_value = jax.random.normal(kv, (inner, C), dtype=jnp.float32)
    w_proj = jax.random.normal(kp, (out_dim, inner), dtype=jnp.float32)

    out = multi_head_attention(x, w_query, w_key, w_value, w_proj,
                               num_heads=num_heads, head_dim=head_dim)
    out = jax.block_until_ready(out)
    assert out.shape == (B, T, out_dim)

    ref = _reference(x, w_query, w_key, w_value, w_proj,
                     num_heads=num_heads, head_dim=head_dim)
    # bf16 MXU operands (f32 accumulation) -> compare against the pure-f32
    # reference with a loose-but-meaningful tolerance.
    rel = jnp.linalg.norm(out - ref) / (jnp.linalg.norm(ref) + 1e-8)
    assert float(rel) < 5e-2, f"relative error too large: {float(rel)}"
    assert jnp.allclose(out, ref, atol=1.5e-1, rtol=1e-1), "mismatch vs reference"

    print("KERNEL_OK")
</pallas_src>

<mosaic_0001>
module attributes {stable_mosaic.version = 11 : i64} {
  func.func @_qkv_kernel(%arg0: i32, %arg1: i32, %arg2: i32, %arg3: memref<1x8x32xf32, #tpu.memory_space<vmem>>, %arg4: memref<1x32x8xbf16, #tpu.memory_space<vmem>>, %arg5: memref<1x32x8xbf16, #tpu.memory_space<vmem>>, %arg6: memref<1x32x8xbf16, #tpu.memory_space<vmem>>, %arg7: memref<1x8x8xbf16, #tpu.memory_space<vmem>>, %arg8: memref<1x8x8xbf16, #tpu.memory_space<vmem>>, %arg9: memref<1x8x8xbf16, #tpu.memory_space<vmem>>) attributes {dimension_semantics = [#tpu.dimension_semantics<parallel>, #tpu.dimension_semantics<parallel>, #tpu.dimension_semantics<parallel>], iteration_bounds = array<i64: 2, 1, 4>, scalar_prefetch = 0 : i64, scratch_operands = 0 : i64, tpu.core_type = #tpu.core_type<tc>, window_params = [{transform_indices = @transform_0, window_bounds = array<i64: 1, 8, 32>}, {transform_indices = @transform_1, window_bounds = array<i64: 1, 32, 8>}, {transform_indices = @transform_2, window_bounds = array<i64: 1, 32, 8>}, {transform_indices = @transform_3, window_bounds = array<i64: 1, 32, 8>}, {transform_indices = @transform_4, window_bounds = array<i64: 1, 8, 8>}, {transform_indices = @transform_5, window_bounds = array<i64: 1, 8, 8>}, {transform_indices = @transform_6, window_bounds = array<i64: 1, 8, 8>}]} {
    %c0 = arith.constant 0 : index
    %c0_0 = arith.constant 0 : index
    %c0_1 = arith.constant 0 : index
    %0 = vector.load %arg3[%c0, %c0_0, %c0_1] : memref<1x8x32xf32, #tpu.memory_space<vmem>>, vector<1x8x32xf32>
    %1 = vector.shape_cast %0 : vector<1x8x32xf32> to vector<8x32xf32>
    %2 = arith.truncf %1 : vector<8x32xf32> to vector<8x32xbf16>
    %c0_2 = arith.constant 0 : index
    %c0_3 = arith.constant 0 : index
    %c0_4 = arith.constant 0 : index
    %3 = vector.load %arg4[%c0_2, %c0_3, %c0_4] : memref<1x32x8xbf16, #tpu.memory_space<vmem>>, vector<1x32x8xbf16>
    %4 = vector.shape_cast %3 : vector<1x32x8xbf16> to vector<32x8xbf16>
    %cst = arith.constant dense<0.000000e+00> : vector<8x8xf32>
    %5 = tpu.matmul %2, %4, %cst {dimension_numbers = #tpu.dot_dimension_numbers<[1], [0], [0], [1], [0, 0, 1, 1], [], []>} : vector<8x32xbf16>, vector<32x8xbf16>, vector<8x8xf32> -> vector<8x8xf32>
    %6 = arith.truncf %5 : vector<8x8xf32> to vector<8x8xbf16>
    %c0_5 = arith.constant 0 : index
    %c0_6 = arith.constant 0 : index
    %c0_7 = arith.constant 0 : index
    %7 = vector.load %arg7[%c0_5, %c0_6, %c0_7] : memref<1x8x8xbf16, #tpu.memory_space<vmem>>, vector<1x8x8xbf16>
    %8 = vector.shape_cast %7 : vector<1x8x8xbf16> to vector<8x8xbf16>
    %9 = vector.shape_cast %6 : vector<8x8xbf16> to vector<1x8x8xbf16>
    tpu.vector_store %arg7[%c0_5, %c0_6, %c0_7], %9 {strides = array<i32>} : memref<1x8x8xbf16, #tpu.memory_space<vmem>>, vector<1x8x8xbf16>,
    %c0_8 = arith.constant 0 : index
    %c0_9 = arith.constant 0 : index
    %c0_10 = arith.constant 0 : index
    %10 = vector.load %arg5[%c0_8, %c0_9, %c0_10] : memref<1x32x8xbf16, #tpu.memory_space<vmem>>, vector<1x32x8xbf16>
    %11 = vector.shape_cast %10 : vector<1x32x8xbf16> to vector<32x8xbf16>
    %cst_11 = arith.constant dense<0.000000e+00> : vector<8x8xf32>
    %12 = tpu.matmul %2, %11, %cst_11 {dimension_numbers = #tpu.dot_dimension_numbers<[1], [0], [0], [1], [0, 0, 1, 1], [], []>} : vector<8x32xbf16>, vector<32x8xbf16>, vector<8x8xf32> -> vector<8x8xf32>
    %13 = arith.truncf %12 : vector<8x8xf32> to vector<8x8xbf16>
    %c0_12 = arith.constant 0 : index
    %c0_13 = arith.constant 0 : index
    %c0_14 = arith.constant 0 : index
    %14 = vector.load %arg8[%c0_12, %c0_13, %c0_14] : memref<1x8x8xbf16, #tpu.memory_space<vmem>>, vector<1x8x8xbf16>
    %15 = vector.shape_cast %14 : vector<1x8x8xbf16> to vector<8x8xbf16>
    %16 = vector.shape_cast %13 : vector<8x8xbf16> to vector<1x8x8xbf16>
    tpu.vector_store %arg8[%c0_12, %c0_13, %c0_14], %16 {strides = array<i32>} : memref<1x8x8xbf16, #tpu.memory_space<vmem>>, vector<1x8x8xbf16>,
    %c0_15 = arith.constant 0 : index
    %c0_16 = arith.constant 0 : index
    %c0_17 = arith.constant 0 : index
    %17 = vector.load %arg6[%c0_15, %c0_16, %c0_17] : memref<1x32x8xbf16, #tpu.memory_space<vmem>>, vector<1x32x8xbf16>
    %18 = vector.shape_cast %17 : vector<1x32x8xbf16> to vector<32x8xbf16>
    %cst_18 = arith.constant dense<0.000000e+00> : vector<8x8xf32>
    %19 = tpu.matmul %2, %18, %cst_18 {dimension_numbers = #tpu.dot_dimension_numbers<[1], [0], [0], [1], [0, 0, 1, 1], [], []>} : vector<8x32xbf16>, vector<32x8xbf16>, vector<8x8xf32> -> vector<8x8xf32>
    %20 = arith.truncf %19 : vector<8x8xf32> to vector<8x8xbf16>
    %c0_19 = arith.constant 0 : index
    %c0_20 = arith.constant 0 : index
    %c0_21 = arith.constant 0 : index
    %21 = vector.load %arg9[%c0_19, %c0_20, %c0_21] : memref<1x8x8xbf16, #tpu.memory_space<vmem>>, vector<1x8x8xbf16>
    %22 = vector.shape_cast %21 : vector<1x8x8xbf16> to vector<8x8xbf16>
    %23 = vector.shape_cast %20 : vector<8x8xbf16> to vector<1x8x8xbf16>
    tpu.vector_store %arg9[%c0_19, %c0_20, %c0_21], %23 {strides = array<i32>} : memref<1x8x8xbf16, #tpu.memory_space<vmem>>, vector<1x8x8xbf16>,
    return
  }
  func.func @transform_0(%arg0: i32, %arg1: i32, %arg2: i32) -> (i32, i32, i32) {
    %c0_i32 = arith.constant 0 : i32
    %c0_i32_0 = arith.constant 0 : i32
    return %arg0, %arg1, %c0_i32 : i32, i32, i32
  }
  func.func @transform_1(%arg0: i32, %arg1: i32, %arg2: i32) -> (i32, i32, i32) {
    %c0_i32 = arith.constant 0 : i32
    %c0_i32_0 = arith.constant 0 : i32
    %c0_i32_1 = arith.constant 0 : i32
    return %arg2, %c0_i32, %c0_i32_0 : i32, i32, i32
  }
  func.func @transform_2(%arg0: i32, %arg1: i32, %arg2: i32) -> (i32, i32, i32) {
    %c0_i32 = arith.constant 0 : i32
    %c0_i32_0 = arith.constant 0 : i32
    %c0_i32_1 = arith.constant 0 : i32
    return %arg2, %c0_i32, %c0_i32_0 : i32, i32, i32
  }
  func.func @transform_3(%arg0: i32, %arg1: i32, %arg2: i32) -> (i32, i32, i32) {
    %c0_i32 = arith.constant 0 : i32
    %c0_i32_0 = arith.constant 0 : i32
    %c0_i32_1 = arith.constant 0 : i32
    return %arg2, %c0_i32, %c0_i32_0 : i32, i32, i32
  }
  func.func @transform_4(%arg0: i32, %arg1: i32, %arg2: i32) -> (i32, i32, i32) {
    %c4_i32 = arith.constant 4 : i32
    %0 = arith.muli %arg0, %c4_i32 : i32
    %1 = arith.addi %0, %arg2 : i32
    %c0_i32 = arith.constant 0 : i32
    %c0_i32_0 = arith.constant 0 : i32
    return %1, %arg1, %c0_i32 : i32, i32, i32
  }
  func.func @transform_5(%arg0: i32, %arg1: i32, %arg2: i32) -> (i32, i32, i32) {
    %c4_i32 = arith.constant 4 : i32
    %0 = arith.muli %arg0, %c4_i32 : i32
    %1 = arith.addi %0, %arg2 : i32
    %c0_i32 = arith.constant 0 : i32
    %c0_i32_0 = arith.constant 0 : i32
    return %1, %arg1, %c0_i32 : i32, i32, i32
  }
  func.func @transform_6(%arg0: i32, %arg1: i32, %arg2: i32) -> (i32, i32, i32) {
    %c4_i32 = arith.constant 4 : i32
    %0 = arith.muli %arg0, %c4_i32 : i32
    %1 = arith.addi %0, %arg2 : i32
    %c0_i32 = arith.constant 0 : i32
    %c0_i32_0 = arith.constant 0 : i32
    return %1, %arg1, %c0_i32 : i32, i32, i32
  }
}

</mosaic_0001>

<bundles_post_ra>
// kernel: tpu_custom_call.1
= control target key start
LH: loop header
LB: loop body
LE: loop exit
PB: predicated region body
PF: predicated region fallthrough
CT: control target
= control target key end

     0   :  { %s2069_s0 = inlined_call_operand.hbm [shape: f32[2,8,32], index: 0, kind: input, shape index: {}]   ;;  %s2070_s1 = inlined_call_operand.hbm [shape: bf16[4,32,8], index: 1, kind: input, shape index: {}]   ;;  %s2071_s2 = inlined_call_operand.hbm [shape: bf16[4,32,8], index: 2, kind: input, shape index: {}]   ;;  %s2072_s3 = inlined_call_operand.hbm [shape: bf16[4,32,8], index: 3, kind: input, shape index: {}]   ;;  %s2073_s4 = inlined_call_operand.hbm [shape: bf16[8,8,8], index: 4, kind: output, shape index: {0}]   ;;  %s2074_s5 = inlined_call_operand.hbm [shape: bf16[8,8,8], index: 5, kind: output, shape index: {1}]   ;;  %s2075_s6 = inlined_call_operand.hbm [shape: bf16[8,8,8], index: 6, kind: output, shape index: {2}]  }
   0x1   :  { %2104 = sst [smem:[#allocation32_spill]] %s2070_s1 }
   0x2   :  { %2105 = sst [smem:[#allocation33_spill]] %s2072_s3 }
   0x3   :  { %2106 = sst [smem:[#allocation34_spill]] %s2073_s4 }
   0x4   :  { %2107 = sst [smem:[#allocation35_spill]] %s2074_s5 }
   0x5   :  { %2108 = sst [smem:[#allocation36_spill]] %s2075_s6 }
   0x6   :  { %12 = vsyncpa [#allocation3], 0 }
   0x7   :  { %14 = vsyncpa [#allocation3 + $0x1], 0 }
   0x8   :  { %15 = vsyncpa [#allocation6], 0 }
   0x9   :  { %17 = vsyncpa [#allocation6 + $0x1], 0 }
   0xa   :  { %18 = vsyncpa [#allocation9], 0 }
   0xb   :  { %20 = vsyncpa [#allocation9 + $0x1], 0 }
   0xc   :  { %21 = vsyncpa [#allocation4], 0 }
   0xd   :  { %23 = vsyncpa [#allocation4 + $0x1], 0 }
   0xe   :  { %24 = vsyncpa [#allocation12], 0 }
   0xf   :  { %26 = vsyncpa [#allocation12 + $0x1], 0  ;;  %s1538_s21 = smov 0   ;;  %s1540_s22 = smov 0  }
  0x10   :  { %s1542_s23 = smov 0   ;;  %s1544_s24 = smov 0  }
  0x11   :  { %s1546_s25 = smov 0   ;;  %s1548_s26 = smov 0  }
  0x12   :  { %s1550_s27 = smov 0   ;;  %s1552_s28 = smov 0  }
  0x13   :  { %s1554_s29 = smov 0   ;;  %s1556_s30 = smov 0  }
  0x14   :  { %s1558_s7 = smov 0   ;;  %s1560_s8 = smov 0  }
  0x15   :  { %s1562_s9 = smov 0   ;;  %s1564_s10 = smov 0  }
  0x16 LB: > { %2109 = sst [smem:[#allocation19_spill]] %s1454_s25  ;;  %s44_s11 = sadd.s32 1, %s1482_s8  ;;  %s1490_s10 = sphi %s1564_s10, %s32_s10   ;;  %s1486_s9 = sphi %s1562_s9, %s2178_s9   ;;  %s1482_s8 = sphi %s1560_s8, %s2168_s8   ;;  %s1478_s7 = sphi %s1558_s7, %s2167_s7   ;;  %s1474_s30 = sphi %s1556_s30, %s2166_s30   ;;  %s1470_s29 = sphi %s1554_s29, %s2165_s29   ;;  %s1466_s28 = sphi %s1552_s28, %s2177_s28   ;;  %s1462_s27 = sphi %s1550_s27, %s2176_s27   ;;  %s1458_s26 = sphi %s1548_s26, %s2175_s26   ;;  %s1454_s25 = sphi %s1546_s25, %s2174_s25   ;;  %s1450_s24 = sphi %s1544_s24, %s2162_s24   ;;  %s1446_s23 = sphi %s1542_s23, %s2173_s23   ;;  %s1442_s22 = sphi %s1540_s22, %s2172_s22   ;;  %s1438_s21 = sphi %s1538_s21, %s2171_s21  }
  0x17   : > { %2110 = sst [smem:[#allocation20_spill]] %s1470_s29  ;;  %p2082_p0 = scmp.eq.s32.totalorder %s1490_s10, 0 }
  0x18   : > { %2111 = sst [smem:[#allocation21_spill]] %s1474_s30  ;;  %p1610_p1 = scmp.ge.s32.totalorder %s44_s11, 4 }
  0x19   : > { %2112 = sst [smem:[#allocation22_spill]] %s1478_s7  ;;  %s86_s13 = sadd.s32 1, %s1458_s26 }
  0x1a   : > { %2113 = sst [smem:[#allocation23_spill]] %s1482_s8  ;;  %p93_p2 = scmp.ne.s32.totalorder %s1458_s26, %s1454_s25 }
  0x1b   : > { %2114 = sst [smem:[#allocation24_spill]] %s1486_s9  ;;  %s2180_s11 = smov (%p1610_p1, %s44_s11), 0 }
  0x1c   : > { %s2115_s12 = scalar_select %p1610_p1, 1, 0 }
  0x1d   : > { %2116 = sst [smem:[#allocation25_spill]] %s2180_s11  ;;  %p95_p3 = por %p93_p2, %p2082_p0 }
  0x1e   : > { %p2081_p4 = scmp.lt.s32.totalorder %s1490_s10, 8  ;;  %s83_s14 = ssub.s32 %s1482_s8, %s2180_s11 }
  0x1f   : > { %s290_s15 = sand.u32 1, %s1490_s10   ;;  %p84_p5 = scmp.eq.s32.totalorder %s83_s14, 0 }
  0x20   : > { %s2078_s16 = sand.u32 1, %s1458_s26   ;;  %s1629_s17 = sshll.u32 %s1482_s8, 8 }
  0x21   : > { %s1632_s18 = scalar_select %p84_p5, %s1458_s26, %s86_s13  }
  0x22   : > { %s1636_s19 = sshll.u32 %s2078_s16, 4  ;;  %s2118_s1 = sld [smem:[#allocation32_spill]] }
  0x23   : > { %2117 = sst [smem:[#allocation26_spill]] %s1632_s18  ;;  %p1646_p6 = pnand %p2081_p4, %p95_p3 }
  0x24   : > { %s294_s13 = scalar_lea.vmem [#allocation5], %s1636_s19  ;;  %s1654_s16 = scalar_lea.sflag [#allocation6], %s290_s15 }
  0x25   : > { %s2119_s14 = scalar_select %p1646_p6, 1, 0 }
  0x26   : > { %s301_s18 = sshll.u32 %s294_s13, 4  ;;  %p1660_p9 = pneg %p1646_p6  ;;  %s1651_s18 = int_to_ptr.vmem [resolvable:$true] %s301_s18 }
  0x28   : > { %s1642_s5 = scalar_lea.hbm %s2118_s1, %s1629_s17  ;;  %s1161_s13 = scalar_lea.hbm %s2118_s1, 1024 }
  0x29   : > { %s1156_s6 = scalar_lea.hbm %s1642_s5, 256  ;;  %p1162_p12 = scmp.lt.u32.totalorder %s1642_s5, %s2118_s1 }
  0x2a   : > { %p1157_p8 = scmp.ne.s32.totalorder %s1642_s5, %s1156_s6  ;;  %p1163_p13 = scmp.lt.u32.totalorder %s1161_s13, %s1156_s6 }
  0x2b   : > { %p1165_p3 = scmp.lt.u32.totalorder %s1156_s6, %s1642_s5 }
  0x2c   : > { %p1159_p10 = pnand %p1660_p9, %p1157_p8  ;;  %p1164_p2 = por %p1163_p13, %p1162_p12 }
  0x2e   : > { %p1160_p11 = pneg %p1159_p10  ;;  %p1166_p5 = por %p1165_p3, %p1164_p2 }
  0x30   : > { %p1167_p4 = pnand %p1166_p5, %p1160_p11 }
  0x32   : > { %1170 = shalt.err (!%p1167_p4)
}
  0x33   : > { %s1171_s15 = scalar_lea.vmem %s1651_s18, 256  ;;  %s1492_s4 = smov [#allocation5]  }
  0x34   : > { %p1172_p8 = scmp.ne.s32.totalorder %s1651_s18, %s1171_s15  ;;  %s1176_s30 = sshll.u32 %s1492_s4, 4  ;;  %s1177_s30 = int_to_ptr.vmem [resolvable:$false] %s1176_s30 }
  0x35   : > { %s1178_s3 = scalar_lea.vmem %s1177_s30, 512  ;;  %p1179_p7 = scmp.lt.s32.totalorder %s1651_s18, %s1177_s30 }
  0x36   : > { %p1174_p10 = pnand %p1172_p8, %p1660_p9  ;;  %p1180_p1 = scmp.lt.s32.totalorder %s1178_s3, %s1171_s15 }
  0x38   : > { %p1175_p0 = pneg %p1174_p10  ;;  %p1181_p12 = por %p1180_p1, %p1179_p7 }
  0x3a   : > { %p1182_p13 = pnand %p1181_p12, %p1175_p0 }
  0x3c   : > { %1185 = shalt.err (!%p1182_p13)
}
  0x3d   : > { %s2084_s7 = smov 64   ;;  %s2086_s6 = smov 4  }
  0x3e   : > { %1015 = dma.hbm_to_vmem [thread:$0]  (!%p1646_p6), %s1642_s5, 256, %s1651_s18, %s1654_s16, %s2084_s7, %s2084_s7, %s2086_s6  }
  0x3f   : > { %p351_p0 = scmp.lt.s32.totalorder %s1490_s10, 9  ;;  %p2121_p1 = scmp.ge.s32.totalorder %s1490_s10, 1 }
  0x40   : > { %s1695_s15 = sadd.s32 4294967295, %s1490_s10   ;;  %s51_s30 = sadd.s32 1, %s1486_s9 }
  0x41   : > { %p1690_p4 = pnand %p2121_p1, %p351_p0  ;;  %s60_s3 = sadd.s32 1, %s1470_s29 }
  0x42   : > { %p2123_p7 = scmp.ne.s32.totalorder %s2115_s12, 0  ;;  %p67_p11 = scmp.ne.s32.totalorder %s1470_s29, %s1466_s28 }
  0x43   : > { %s2122_s13 = scalar_select %p1690_p4, 1, 0 }
  0x44   : > { %s2182_s30 = smov (!%p2123_p7, %s51_s30), %s1486_s9  ;;  %p73_p2 = scmp.ne.s32.totalorder %s1466_s28, %s1462_s27 }
  0x45   : > { %p53_p3 = scmp.ge.s32.totalorder %s2182_s30, 2  ;;  %p74_p5 = scmp.eq.s32.totalorder %s1695_s15, 0 }
  0x46   : > { %p2124_p8 = scmp.eq.s32.totalorder %s1490_s10, 0  ;;  %p99_p12 = scmp.ne.s32.totalorder %s1454_s25, %s1450_s24 }
  0x47   : > { %s2184_s30 = smov (%p53_p3, %s2182_s30), 0  ;;  %p1718_p13 = por %p74_p5, %p73_p2 }
  0x48   : > { %p1710_p10 = por %p2124_p8, %p67_p11  ;;  %2126 = sst [smem:[#allocation27_spill]] %s2184_s30 }
  0x49   : > { %s2127_s12 = scalar_select %p1718_p13, 1, 0 }
  0x4a   : > { %p1722_p0 = por %p99_p12, %p74_p5  ;;  %s55_s18 = ssub.s32 %s1486_s9, %s2184_s30 }
  0x4b   : > { %2128 = sst [smem:[#allocation28_spill]] %s2127_s12  ;;  %s912_s7 = sshll.u32 %s1486_s9, 2 }
  0x4c   : > { %s2129_s27 = scalar_select %p1722_p0, 1, 0 }
  0x4d   : > { %p58_p1 = scmp.eq.s32.totalorder %s55_s18, 0  ;;  %s162_s24 = sadd.s32 %s1482_s8, %s912_s7 }
  0x4e   : > { %2130 = sst [smem:[#allocation29_spill]] %s2129_s27  ;;  %s913_s6 = sshll.u32 %s2184_s30, 2 }
  0x4f   : > { %s170_s4 = sadd.s32 1, %s1446_s23  ;;  %s164_s25 = sadd.s32 %s913_s6, %s2180_s11 }
  0x50   : > { %s1733_s1 = scalar_select %p58_p1, %s1470_s29, %s60_s3  }
  0x51   : > { %p180_p7 = scmp.ne.s32.totalorder %s1446_s23, %s1442_s22  ;;  %s165_s12 = ssub.s32 %s162_s24, %s164_s25 }
  0x52   : > { %2131 = sst [smem:[#allocation30_spill]] %s1733_s1  ;;  %p181_p11 = scmp.eq.s32.totalorder %s1695_s15, 7 }
  0x53   : > { %p168_p2 = scmp.eq.s32.totalorder %s165_s12, 0  ;;  %p186_p3 = scmp.ne.s32.totalorder %s1442_s22, %s1438_s21 }
  0x54   : > { %p1741_p5 = por %p181_p11, %p180_p7  ;;  %s2133_s7 = sadd.s32 4294967294, %s1490_s10  }
  0x55   : > { %p187_p8 = scmp.eq.s32.totalorder %s2133_s7, 7  ;;  %s271_s6 = sand.u32 1, %s1470_s29  }
  0x56   : > { %s2132_s27 = scalar_select %p1741_p5, 1, 0 }
  0x57   : > { %s1748_s18 = scalar_select %p168_p2, %s1446_s23, %s170_s4  }
  0x58   : > { %p1750_p12 = por %p187_p8, %p186_p3  ;;  %s920_s30 = sshll.u32 %s271_s6, 3 }
  0x59   : > { %2134 = sst [smem:[#allocation31_spill]] %s1748_s18  ;;  %s921_s25 = sshll.u32 %s1486_s9, 7 }
  0x5a   : > { %s2135_s3 = scalar_select %p1750_p12, 1, 0 }
  0x5b   : > { %s1759_s12 = scalar_lea.hbm %s2069_s0, %s921_s25  ;;  %s275_s8 = scalar_lea.vmem [#allocation2], %s920_s30 }
  0x5c   : > { %s283_s1 = sshll.u32 %s275_s8, 4  ;;  %p2136_p1 = scmp.lt.s32.totalorder %s1490_s10, 8  ;;  %s1761_s1 = int_to_ptr.vmem [resolvable:$true] %s283_s1 }
  0x5d   : > { %s1775_s11 = scalar_lea.hbm %s2071_s2, %s1629_s17  ;;  %s315_s25 = scalar_lea.vmem [#allocation7], %s1636_s19 }
  0x5e   : > { %p1767_p7 = pnand %p2136_p1, %p1710_p10  ;;  %s1778_s24 = sshll.u32 %s315_s25, 4  ;;  %s1806_s24 = int_to_ptr.vmem [resolvable:$true] %s1778_s24 }
  0x5f   : > { %s272_s8 = scalar_lea.sflag [#allocation3], %s271_s6  ;;  %s1186_s30 = scalar_lea.hbm %s1759_s12, 128 }
  0x60   : > { %p1187_p11 = scmp.ne.s32.totalorder %s1759_s12, %s1186_s30  ;;  %p1188_p2 = pneg %p1767_p7 }
  0x61   : > { %s1191_s9 = scalar_lea.hbm %s2069_s0, 256  ;;  %p1192_p8 = scmp.lt.u32.totalorder %s1759_s12, %s2069_s0 }
  0x62   : > { %p1189_p10 = pnand %p1188_p2, %p1187_p11  ;;  %p1193_p1 = scmp.lt.u32.totalorder %s1191_s9, %s1186_s30 }
  0x63   : > { %p1195_p5 = scmp.lt.u32.totalorder %s1186_s30, %s1759_s12 }
  0x64   : > { %p1190_p3 = pneg %p1189_p10  ;;  %p1194_p12 = por %p1193_p1, %p1192_p8 }
  0x66   : > { %p1196_p0 = por %p1195_p5, %p1194_p12 }
  0x68   : > { %p1197_p13 = pnand %p1196_p0, %p1190_p3 }
  0x6a   : > { %1200 = shalt.err (!%p1197_p13)
}
  0x6b   : > { %s1201_s6 = scalar_lea.vmem %s1761_s1, 128  ;;  %s1495_s29 = smov [#allocation2]  }
  0x6c   : > { %p1202_p11 = scmp.ne.s32.totalorder %s1761_s1, %s1201_s6  ;;  %s1206_s25 = sshll.u32 %s1495_s29, 4  ;;  %s1207_s25 = int_to_ptr.vmem [resolvable:$false] %s1206_s25 }
  0x6d   : > { %s1208_s18 = scalar_lea.vmem %s1207_s25, 256  ;;  %p1209_p6 = scmp.lt.s32.totalorder %s1761_s1, %s1207_s25 }
  0x6e   : > { %p1204_p10 = pnand %p1202_p11, %p1188_p2  ;;  %p1210_p8 = scmp.lt.s32.totalorder %s1208_s18, %s1201_s6 }
  0x70   : > { %p1205_p4 = pneg %p1204_p10  ;;  %p1211_p1 = por %p1210_p8, %p1209_p6 }
  0x72   : > { %p1212_p5 = pnand %p1211_p1, %p1205_p4 }
  0x74   : > { %1215 = shalt.err (!%p1212_p5)
}
  0x75   : > { %1012 = dma.hbm_to_vmem [thread:$0]  (!%p1767_p7), %s1759_s12, 128, %s1761_s1, %s272_s8  }
  0x76   : > { %s1216_s30 = scalar_lea.hbm %s1775_s11, 256  ;;  %s1221_s4 = scalar_lea.hbm %s2071_s2, 1024 }
  0x77   : > { %p1217_p13 = scmp.ne.s32.totalorder %s1775_s11, %s1216_s30  ;;  %p1222_p4 = scmp.lt.u32.totalorder %s1775_s11, %s2071_s2 }
  0x78   : > { %p1223_p12 = scmp.lt.u32.totalorder %s1221_s4, %s1216_s30  ;;  %p1225_p3 = scmp.lt.u32.totalorder %s1216_s30, %s1775_s11 }
  0x79   : > { %p1219_p0 = pnand %p1217_p13, %p1660_p9 }
  0x7a   : > { %p1224_p2 = por %p1223_p12, %p1222_p4 }
  0x7b   : > { %p1220_p6 = pneg %p1219_p0 }
  0x7c   : > { %p1226_p11 = por %p1225_p3, %p1224_p2 }
  0x7e   : > { %p1227_p7 = pnand %p1226_p11, %p1220_p6 }
  0x80   : > { %1230 = shalt.err (!%p1227_p7)
}
  0x81   : > { %s1231_s1 = scalar_lea.vmem %s1806_s24, 256  ;;  %s1496_s12 = smov [#allocation7]  }
  0x82   : > { %p1232_p10 = scmp.ne.s32.totalorder %s1806_s24, %s1231_s1  ;;  %s1236_s8 = sshll.u32 %s1496_s12, 4  ;;  %s1237_s8 = int_to_ptr.vmem [resolvable:$false] %s1236_s8 }
  0x83   : > { %s1238_s29 = scalar_lea.vmem %s1237_s8, 512  ;;  %p1239_p5 = scmp.lt.s32.totalorder %s1806_s24, %s1237_s8 }
  0x84   : > { %p1234_p8 = pnand %p1232_p10, %p1660_p9  ;;  %p1240_p13 = scmp.lt.s32.totalorder %s1238_s29, %s1231_s1 }
  0x86   : > { %p1235_p1 = pneg %p1234_p8  ;;  %p1241_p0 = por %p1240_p13, %p1239_p5 }
  0x88   : > { %p1242_p4 = pnand %p1241_p0, %p1235_p1 }
  0x8a   : > { %1245 = shalt.err (!%p1242_p4)
}
  0x8b   : > { %p2138_p6 = scmp.ne.s32.totalorder %s2119_s14, 0  ;;  %s2139_s25 = smov 4  }
  0x8c   : > { %s2140_s18 = smov 64   ;;  %s2141_s9 = sld [smem:[#allocation33_spill]] }
  0x8d   : > { %1018 = dma.hbm_to_vmem [thread:$0]  (!%p2138_p6), %s1775_s11, 256, %s1806_s24, %s1654_s16, %s2140_s18, %s2140_s18, %s2139_s25  }
  0x8e   : > { %s336_s6 = scalar_lea.vmem [#allocation8], %s1636_s19  ;;  %s2143_s12 = sand.u32 1, %s1458_s26  }
  0x8f   : > { %s343_s1 = sshll.u32 %s336_s6, 4  ;;  %s1844_s8 = scalar_lea.sflag [#allocation9], %s2143_s12  ;;  %s1840_s1 = int_to_ptr.vmem [resolvable:$true] %s343_s1 }
  0x92   : > { %s2142_s4 = smov %s2141_s9  ;;  %s1837_s7 = scalar_lea.hbm %s2141_s9, %s1629_s17 }
  0x93   : > { %s1246_s29 = scalar_lea.hbm %s1837_s7, 256  ;;  %s1251_s17 = scalar_lea.hbm %s2142_s4, 1024 }
  0x94   : > { %p1247_p12 = scmp.ne.s32.totalorder %s1837_s7, %s1246_s29  ;;  %p1252_p11 = scmp.lt.u32.totalorder %s1837_s7, %s2142_s4 }
  0x95   : > { %p1253_p7 = scmp.lt.u32.totalorder %s1251_s17, %s1246_s29  ;;  %p1255_p8 = scmp.lt.u32.totalorder %s1246_s29, %s1837_s7 }
  0x96   : > { %p1249_p2 = pnand %p1247_p12, %p1660_p9 }
  0x97   : > { %p1254_p10 = por %p1253_p7, %p1252_p11 }
  0x98   : > { %p1250_p3 = pneg %p1249_p2 }
  0x99   : > { %p1256_p1 = por %p1255_p8, %p1254_p10 }
  0x9b   : > { %p1257_p5 = pnand %p1256_p1, %p1250_p3 }
  0x9d   : > { %1260 = shalt.err (!%p1257_p5)
}
  0x9e   : > { %s1261_s19 = scalar_lea.vmem %s1840_s1, 256  ;;  %s1497_s5 = smov [#allocation8]  }
  0x9f   : > { %p1262_p13 = scmp.ne.s32.totalorder %s1840_s1, %s1261_s19  ;;  %s1266_s9 = sshll.u32 %s1497_s5, 4  ;;  %s1267_s9 = int_to_ptr.vmem [resolvable:$false] %s1266_s9 }
  0xa0   : > { %s1268_s6 = scalar_lea.vmem %s1267_s9, 512  ;;  %p1269_p12 = scmp.lt.s32.totalorder %s1840_s1, %s1267_s9 }
  0xa1   : > { %p1264_p0 = pnand %p1262_p13, %p1660_p9  ;;  %p1270_p2 = scmp.lt.s32.totalorder %s1268_s6, %s1261_s19 }
  0xa3   : > { %p1265_p4 = pneg %p1264_p0  ;;  %p1271_p11 = por %p1270_p2, %p1269_p12 }
  0xa5   : > { %p1272_p7 = pnand %p1271_p11, %p1265_p4 }
  0xa7   : > { %1275 = shalt.err (!%p1272_p7)
}
  0xa8   : > { %1021 = dma.hbm_to_vmem [thread:$0]  (!%p2138_p6), %s1837_s7, 256, %s1840_s1, %s1844_s8, %s2140_s18, %s2140_s18, %s2139_s25  }
  0xa9   : > { %p2144_p9 = scmp.ne.s32.totalorder %s2122_s13, 0 }
  0xaa   : > { %s2145_s20 = sld [smem:[#allocation28_spill]] (!%p2144_p9)  ;;  %s357_s12 = sand.u32 (!%p2144_p9), 1, %s1466_s28  }
  0xab   : > { %355 = sbr.rel (%p2144_p9) target bundleno = 480 (0x1e0), region = 36  ;;  %s932_s29 = sshll.u32 (!%p2144_p9), %s357_s12, 3 }
  0xac   : > { %s358_s16 = scalar_lea.sflag (!%p2144_p9), [#allocation3], %s357_s12  ;;  %s361_s11 = scalar_lea.vmem (!%p2144_p9), [#allocation2], %s932_s29 }
  0xb0   : > { %p2146_p3 = scmp.ne.s32.totalorder (!%p2144_p9), %s2145_s20, 0 }
  0xb2   : > { %1417 = dma.done.wait (%p2146_p3), %s358_s16, 128  }
  0xb3   : > { %1419 = vsyncadd (%p2146_p3), %s358_s16, 4294967168  ;;  %s2147_s14 = sld [smem:[#allocation19_spill]]  ;;  %s2148_s17 = sld [smem:[#allocation29_spill]] }
  0xb4   : > { %s2103_s24 = sand.u32 1, %s1695_s15  }
  0xb5   : > { %s367_s13 = scalar_lea.sflag [#allocation6], %s2103_s24 }
  0xb9   : > { %s368_s25 = sand.u32 1, %s2147_s14   ;;  %p2149_p6 = scmp.ne.s32.totalorder %s2148_s17, 0 }
  0xba   : > { %s1880_s18 = sshll.u32 %s368_s25, 4 }
  0xbb   : > { %s370_s7 = scalar_lea.vmem [#allocation5], %s1880_s18 }
  0xbc   : > { %1421 = dma.done.wait (%p2149_p6), %s367_s13, 512  }
  0xbd   : > { %1423 = vsyncadd (%p2149_p6), %s367_s13, 4294966784  ;;  %s379_s1 = scalar_lea.vmem [#allocation7], %s1880_s18  ;;  %s385_s8 = scalar_lea.sflag [#allocation9], %s368_s25 }
  0xbe   : > { %s388_s30 = scalar_lea.vmem [#allocation8], %s1880_s18 }
  0xbf   : > { %1425 = dma.done.wait (%p2149_p6), %s385_s8, 256  }
  0xc0   : > { %1427 = vsyncadd (%p2149_p6), %s385_s8, 4294967040  ;;  %v1498_v0 = vmov 0.0   ;;  %vm1499_vm0 = vmmov 0   ;;  %v1150_v1 = vld [vmem:[%s370_s7] sm:$0xff]   ;;  %v1151_v2 = vld [vmem:[%s370_s7 + $0x8] sm:$0xff]   ;;  %s2150_s19 = sld [smem:[#allocation22_spill]] }
  0xc1   : > { %971 = vmatprep.subr.bf16.mxu0 %v1498_v0  ;;  %979 = vmatprep.subr.bf16.mxu1 %v1498_v0  ;;  %v1152_v3 = vld [vmem:[%s379_s1] sm:$0xff]   ;;  %v449_v4 = vld [vmem:[%s361_s11] sm:$0xff]  ;;  %s2151_s5 = sld [smem:[#allocation21_spill]]  ;;  %vm467_vm1 = vcmask 261120   ;;  %s425_s9 = sand.u32 1, %s1442_s22   ;;  %vm512_vm2 = vcmask 60416  }
  0xc2   : > { %975 = vmatprep.mubr.msk.bf16.mxu0 %vm1499_vm0, %v1498_v0  ;;  %983 = vmatprep.mubr.msk.bf16.mxu1 %vm1499_vm0, %v1498_v0  ;;  %v450_v5 = vpack.c.bf16 %v449_v4, %v449_v4  ;;  %v1154_v6 = vld [vmem:[%s379_s1 + $0x8] sm:$0xff]   ;;  %v1153_v7 = vld [vmem:[%s388_s30] sm:$0xff]   ;;  %s1900_s20 = sshll.u32 %s425_s9, 2  ;;  %s2152_s13 = sld [smem:[#allocation34_spill]] }
  0xc3   : > { %972 = vmatpush3.bf16.msra.mxu0 %v1150_v1  ;;  %980 = vmatpush3.bf16.msra.mxu1 %v1152_v3  ;;  %v1155_v8 = vld [vmem:[%s388_s30 + $0x8] sm:$0xff]   ;;  %s427_s16 = scalar_lea.vmem [#allocation10], %s1900_s20  ;;  %s434_s14 = scalar_lea.vmem [#allocation11], %s1900_s20 }
  0xc4   : > { %973 = vmatprep.subr.bf16.mxu0 %v1498_v0  ;;  %981 = vmatprep.subr.bf16.mxu1 %v1498_v0  ;;  %s657_s11 = sshll.u32 %s427_s16, 4  ;;  %s673_s17 = sshll.u32 %s434_s14, 4  ;;  %s1915_s11 = int_to_ptr.vmem [resolvable:$true] %s657_s11  ;;  %s1923_s17 = int_to_ptr.vmem [resolvable:$true] %s673_s17 }
  0xc5   : > { %s2153_s30 = sld [smem:[#allocation35_spill]]  ;;  %p2155_p8 = scmp.ne.s32.totalorder %s2132_s27, 0 }
  0xc6   : > { %s951_s6 = sshll.u32 %s2150_s19, 2  ;;  %s1500_s25 = smov [#allocation10]  }
  0xc7   : > { %974 = vmatpush3.bf16.msra.mxu0 %v1151_v2  ;;  %982 = vmatpush3.bf16.msra.mxu1 %v1154_v6  ;;  %s649_s12 = sadd.s32 %s2151_s5, %s951_s6  ;;  %s631_s6 = scalar_lea.sflag [#allocation4], %s425_s9 }
  0xc8   : > { %987 = vmatprep.subr.bf16.mxu0 %v1498_v0  ;;  %s1903_s29 = sshll.u32 %s649_s12, 6  ;;  %s1276_s12 = scalar_lea.vmem %s1915_s11, 64 }
  0xc9   : > { %s1913_s7 = scalar_lea.hbm %s2152_s13, %s1903_s29  ;;  %p1277_p10 = scmp.ne.s32.totalorder %s1915_s11, %s1276_s12 }
  0xca   : > { %976 = vmatmul.mubr.msk.bf16.vlgmr.msra.gmra.mrb[0].mxu0 %vm467_vm1, %v450_v5  ;;  %984 = vmatmul.mubr.msk.bf16.vlgmr.msra.gmra.mrb[0].mxu1 %vm467_vm1, %v450_v5  ;;  %s1280_s18 = sshll.u32 %s1500_s25, 4  ;;  %s1281_s18 = int_to_ptr.vmem [resolvable:$false] %s1280_s18 }
  0xcb   : > { %988 = vmatpush3.bf16.msra.mxu0 %v1153_v7  ;;  %991 = vmatprep.mubr.msk.bf16.mxu0 %vm1499_vm0, %v1498_v0  ;;  %s2154_s19 = smov %s2153_s30  ;;  %s1921_s5 = scalar_lea.hbm %s2153_s30, %s1903_s29 }
  0xcc   : > { %989 = vmatprep.subr.bf16.mxu0 %v1498_v0  ;;  %p1278_p1 = pnand %p1277_p10, %p2155_p8  ;;  %s1282_s24 = scalar_lea.vmem %s1281_s18, 128 }
  0xcd   : > { %p1283_p13 = scmp.lt.s32.totalorder %s1915_s11, %s1281_s18  ;;  %p1284_p0 = scmp.lt.s32.totalorder %s1282_s24, %s1276_s12 }
  0xce   : > { %p1279_p5 = pneg %p1278_p1 }
  0xcf   : > { %990 = vmatpush3.bf16.msra.mxu0 %v1155_v8  ;;  %p1285_p4 = por %p1284_p0, %p1283_p13 }
  0xd1   : > { %p1286_p12 = pnand %p1285_p4, %p1279_p5 }
  0xd2   : > { %992 = vmatmul.mubr.msk.bf16.vlgmr.msra.gmra.mrb[4].mxu0 %vm467_vm1, %v450_v5 }
 0x19d   : > { %v505_v9 = vpop.f32.mrb[0].mxu0  ;;  %v564_v13 = vpop.f32.mrb[0].mxu1 }
 0x19e   : > { %v511_v10 = vpack.c.bf16 %v505_v9, %v505_v9  ;;  %v977_v11 = vpop.f32.mrb[1].mxu0  ;;  %v570_v15 = vpack.c.bf16 %v564_v13, %v564_v13  ;;  %v985_v16 = vpop.f32.mrb[1].mxu1 }
 0x19f   : > { %v508_v12 = vpop.f32.mrb[2].mxu0  ;;  %v567_v17 = vpop.f32.mrb[2].mxu1 }
 0x1a0   : > { %v978_v14 = vpop.f32.mrb[3].mxu0  ;;  %513 = vst.msk [vmem:[%s427_s16] sm:$0xf] %vm512_vm2, %v511_v10 }
 0x1a1   : > { %1289 = shalt.err (!%p1286_p12)
}
 0x1a2   : > { %s1290_s9 = scalar_lea.hbm %s1913_s7, 64  ;;  %s1294_s8 = scalar_lea.hbm %s2152_s13, 512 }
 0x1a3   : > { %p1291_p2 = scmp.ne.s32.totalorder %s1913_s7, %s1290_s9  ;;  %p1295_p9 = scmp.lt.u32.totalorder %s1913_s7, %s2152_s13 }
 0x1a4   : > { %p1296_p3 = scmp.lt.u32.totalorder %s1294_s8, %s1290_s9  ;;  %p1298_p10 = scmp.lt.u32.totalorder %s1290_s9, %s1913_s7 }
 0x1a5   : > { %p1292_p11 = pnand %p1291_p2, %p2155_p8 }
 0x1a6   : > { %p1297_p6 = por %p1296_p3, %p1295_p9 }
 0x1a7   : > { %p1293_p7 = pneg %p1292_p11 }
 0x1a8   : > { %p1299_p1 = por %p1298_p10, %p1297_p6 }
 0x1aa   : > { %p1300_p5 = pnand %p1299_p1, %p1293_p7 }
 0x1ac   : > { %1303 = shalt.err (!%p1300_p5)
}
 0x1ad   : > { %1003 = dma.vmem_to_hbm [thread:$0]  (%p2155_p8), %s1915_s11, 64, %s1913_s7, %s631_s6   ;;  %v986_v18 = vpop.f32.mrb[3].mxu1  ;;  %571 = vst.msk [vmem:[%s434_s14] sm:$0xf] %vm512_vm2, %v570_v15 }
 0x1ae   : > { %s441_s24 = scalar_lea.vmem [#allocation13], %s1900_s20  ;;  %s2156_s18 = sand.u32 1, %s1695_s15  }
 0x1af   : > { %s1953_s12 = sshll.u32 %s441_s24, 4  ;;  %s1957_s9 = scalar_lea.sflag [#allocation12], %s2156_s18  ;;  %s1988_s12 = int_to_ptr.vmem [resolvable:$true] %s1953_s12 }
 0x1b0   : > { %s1304_s16 = scalar_lea.vmem %s1923_s17, 64  ;;  %s1501_s1 = smov [#allocation11]  }
 0x1b1   : > { %p1305_p13 = scmp.ne.s32.totalorder %s1923_s17, %s1304_s16  ;;  %s1308_s8 = sshll.u32 %s1501_s1, 4  ;;  %s1309_s8 = int_to_ptr.vmem [resolvable:$false] %s1308_s8 }
 0x1b2   : > { %s1310_s11 = scalar_lea.vmem %s1309_s8, 128  ;;  %p1311_p12 = scmp.lt.s32.totalorder %s1923_s17, %s1309_s8 }
 0x1b3   : > { %p1306_p0 = pnand %p1305_p13, %p2155_p8  ;;  %p1312_p2 = scmp.lt.s32.totalorder %s1310_s11, %s1304_s16 }
 0x1b5   : > { %p1307_p4 = pneg %p1306_p0  ;;  %p1313_p11 = por %p1312_p2, %p1311_p12 }
 0x1b7   : > { %p1314_p7 = pnand %p1313_p11, %p1307_p4 }
 0x1b9   : > { %1317 = shalt.err (!%p1314_p7)
}
 0x1ba   : > { %s1318_s15 = scalar_lea.hbm %s1921_s5, 64  ;;  %s1322_s6 = scalar_lea.hbm %s2154_s19, 512 }
 0x1bb   : > { %p1319_p9 = scmp.ne.s32.totalorder %s1921_s5, %s1318_s15  ;;  %p1323_p10 = scmp.lt.u32.totalorder %s1921_s5, %s2154_s19 }
 0x1bc   : > { %p1324_p1 = scmp.lt.u32.totalorder %s1322_s6, %s1318_s15  ;;  %p1326_p13 = scmp.lt.u32.totalorder %s1318_s15, %s1921_s5 }
 0x1bd   : > { %p1320_p3 = pnand %p1319_p9, %p2155_p8 }
 0x1be   : > { %p1325_p5 = por %p1324_p1, %p1323_p10 }
 0x1bf   : > { %p1321_p6 = pneg %p1320_p3 }
 0x1c0   : > { %p1327_p0 = por %p1326_p13, %p1325_p5 }
 0x1c2   : > { %p1328_p4 = pnand %p1327_p0, %p1321_p6 }
 0x1c4   : > { %1331 = shalt.err (!%p1328_p4)
}
 0x1c5   : > { %1004 = dma.vmem_to_hbm [thread:$0]  (%p2155_p8), %s1923_s17, 64, %s1921_s5, %s1957_s9   ;;  %v622_v19 = vpop.f32.mrb[4].mxu0 }
 0x1c6   : > { %v628_v20 = vpack.c.bf16 %v622_v19, %v622_v19  ;;  %v993_v21 = vpop.f32.mrb[5].mxu0  ;;  %s2157_s1 = sld [smem:[#allocation36_spill]]  ;;  %s1332_s11 = scalar_lea.vmem %s1988_s12, 64 }
 0x1c7   : > { %v625_v22 = vpop.f32.mrb[6].mxu0  ;;  %p1333_p12 = scmp.ne.s32.totalorder %s1988_s12, %s1332_s11  ;;  %s1502_s17 = smov [#allocation13]  }
 0x1c8   : > { %v994_v23 = vpop.f32.mrb[7].mxu0  ;;  %629 = vst.msk [vmem:[%s441_s24] sm:$0xf] %vm512_vm2, %v628_v20  ;;  %s1336_s5 = sshll.u32 %s1502_s17, 4  ;;  %s1337_s5 = int_to_ptr.vmem [resolvable:$false] %s1336_s5 }
 0x1c9   : > { %p1334_p2 = pnand %p1333_p12, %p2155_p8  ;;  %p1339_p7 = scmp.lt.s32.totalorder %s1988_s12, %s1337_s5 }
 0x1cb   : > { %p1335_p11 = pneg %p1334_p2 }
 0x1cc   : > { %s1985_s8 = scalar_lea.hbm %s2157_s1, %s1903_s29  ;;  %s1338_s29 = scalar_lea.vmem %s1337_s5, 128 }
 0x1cd   : > { %p1340_p9 = scmp.lt.s32.totalorder %s1338_s29, %s1332_s11 }
 0x1cf   : > { %p1341_p3 = por %p1340_p9, %p1339_p7 }
 0x1d1   : > { %p1342_p6 = pnand %p1341_p3, %p1335_p11 }
 0x1d3   : > { %1345 = shalt.err (!%p1342_p6)
}
 0x1d4   : > { %s1346_s20 = scalar_lea.hbm %s1985_s8, 64  ;;  %s1350_s14 = scalar_lea.hbm %s2157_s1, 512 }
 0x1d5   : > { %p1347_p10 = scmp.ne.s32.totalorder %s1985_s8, %s1346_s20  ;;  %p1351_p13 = scmp.lt.u32.totalorder %s1985_s8, %s2157_s1 }
 0x1d6   : > { %p1352_p0 = scmp.lt.u32.totalorder %s1350_s14, %s1346_s20  ;;  %p1354_p12 = scmp.lt.u32.totalorder %s1346_s20, %s1985_s8 }
 0x1d7   : > { %p1348_p1 = pnand %p1347_p10, %p2155_p8 }
 0x1d8   : > { %p1353_p4 = por %p1352_p0, %p1351_p13 }
 0x1d9   : > { %p1349_p5 = pneg %p1348_p1 }
 0x1da   : > { %p1355_p2 = por %p1354_p12, %p1353_p4 }
 0x1dc   : > { %p1356_p11 = pnand %p1355_p2, %p1349_p5 }
 0x1de   : > { %1359 = shalt.err (!%p1356_p11)
}
 0x1df   : > { %1005 = dma.vmem_to_hbm [thread:$0]  (%p2155_p8), %s1988_s12, 64, %s1985_s8, %s1957_s9  }
 0x1e0 PF: > { %p1033_p7 = scmp.ge.s32.totalorder %s1490_s10, 2  ;;  %s701_s30 = sand.u32 1, %s1438_s21  }
 0x1e1   : > { %p2158_p9 = scmp.ne.s32.totalorder %s2135_s3, 0  ;;  %s702_s25 = scalar_lea.sflag [#allocation4], %s701_s30 }
 0x1e3   : > { %p1023_p3 = pnand %p1033_p7, %p2158_p9 }
 0x1e5   : > { %1429 = dma.done.wait (!%p1023_p3), %s702_s25, 64  }
 0x1e6   : > { %1431 = vsyncadd (!%p1023_p3), %s702_s25, 4294967232  ;;  %s2159_s18 = sadd.s32 4294967294, %s1490_s10  }
 0x1e7   : > { %s710_s16 = sand.u32 1, %s2159_s18  }
 0x1e8   : > { %s711_s11 = scalar_lea.sflag [#allocation12], %s710_s16 }
 0x1e9   : > { %1433 = dma.done.wait (!%p1023_p3), %s711_s11, 128  }
 0x1ea   : > { %1435 = vsyncadd (!%p1023_p3), %s711_s11, 4294967168  ;;  %s32_s10 = sadd.s32 1, %s1490_s10   ;;  %s2161_s12 = sld [smem:[#allocation31_spill]] }
 0x1eb   : > { %p2022_p8 = scmp.ge.s32.totalorder %s32_s10, 10   ;;  %s2162_s24 = sld [smem:[#allocation19_spill]] }
 0x1ec   : > { %s2163_s3 = sld [smem:[#allocation26_spill]]  ;;  %s2164_s9 = sld [smem:[#allocation20_spill]] }
 0x1ed   : > { %s2165_s29 = sld [smem:[#allocation30_spill]]  ;;  %s2166_s30 = sld [smem:[#allocation23_spill]] }
 0x1ee   : > { %s2167_s7 = sld [smem:[#allocation24_spill]]  ;;  %s2168_s8 = sld [smem:[#allocation25_spill]] }
 0x1ef   : > { %s2169_s17 = sld [smem:[#allocation27_spill]]  ;;  %s2171_s21 = smov %s1442_s22 }
 0x1f0   : > { %s2172_s22 = smov %s1446_s23  ;;  %s2173_s23 = smov %s2161_s12 }
 0x1f1   : > { %s2174_s25 = smov %s1458_s26  ;;  %s2176_s27 = smov %s1466_s28 }
 0x1f2   : > { %s2175_s26 = smov %s2163_s3  ;;  %s2177_s28 = smov %s2164_s9 }
 0x1f3   :  { %31 = sbr.rel (!%p2022_p8) target bundleno = 22 (0x16), region = 150 }
 0x1f5   : > { %s2178_s9 = smov %s2169_s17 }
 0x1fa   :  { %725 = vsyncpa [#allocation3], 1 }
 0x1fb   :  { %727 = vsyncpa [#allocation3 + $0x1], 1 }
 0x1fc   :  { %728 = vsyncpa [#allocation6], 1 }
 0x1fd   :  { %730 = vsyncpa [#allocation6 + $0x1], 1 }
 0x1fe   :  { %731 = vsyncpa [#allocation9], 1 }
 0x1ff   :  { %733 = vsyncpa [#allocation9 + $0x1], 1 }
 0x200   :  { %734 = vsyncpa [#allocation4], 1 }
 0x201   :  { %736 = vsyncpa [#allocation4 + $0x1], 1 }
 0x202   :  { %737 = vsyncpa [#allocation12], 1 }
 0x203   :  { %739 = vsyncpa [#allocation12 + $0x1], 1 }

</bundles_post_ra>
